<compile_context>
chip_gen: v7x
topology: tpu7x:2x2x1
jax: 0.10.0
libtpu: 0.0.40
codegen_flags: <defaults>
</compile_context>

<pallas_src>
import functools
import math

import jax
import jax.numpy as jnp
from jax.experimental import pallas as pl
from jax.experimental.pallas import tpu as pltpu


# ----------------------------------------------------------------------------
# Prologue kernels: kv-source (+ optional sr conv / LayerNorm) and full-width
# K/V projection, once per batch element.  grid = (B,)
# ----------------------------------------------------------------------------

def _kv_prep_sr_kernel(xp_ref, srw_ref, srb_ref, nw_ref, nb_ref, kvw_ref,
                       kv_ref):
    """sr_ratio > 1: conv(sr) as patch matmul -> LayerNorm -> kv = xn @ Wkv."""
    xp = xp_ref[0]                                                   # (Nkv, P) bf16
    xs = jnp.dot(xp, srw_ref[...],
                 preferred_element_type=jnp.float32) + srb_ref[...]  # (Nkv, C) f32
    mu = jnp.mean(xs, axis=-1, keepdims=True)
    var = jnp.mean((xs - mu) ** 2, axis=-1, keepdims=True)
    xn = (xs - mu) * jax.lax.rsqrt(var + 1e-5)                       # eps = 1e-5
    xn = (xn * nw_ref[...] + nb_ref[...]).astype(jnp.bfloat16)       # (Nkv, C)
    kv_ref[0] = jnp.dot(xn, kvw_ref[...],
                        preferred_element_type=jnp.float32).astype(kv_ref.dtype)


def _kv_prep_kernel(x_ref, kvw_ref, kv_ref):
    """sr_ratio == 1: kv = x @ Wkv (full-width (N,C)x(C,2C) matmul)."""
    kv_ref[0] = jnp.dot(x_ref[0], kvw_ref[...],
                        preferred_element_type=jnp.float32).astype(kv_ref.dtype)


# ----------------------------------------------------------------------------
# Attention kernel.  grid = (B, N // TQ); heads unrolled in-kernel.
# ----------------------------------------------------------------------------

def _attn_kernel(x_ref, kt_ref, v_ref, qw_ref, pw_ref, pb_ref, o_ref, *, nh, d):
    x = x_ref[0]                                                     # (TQ, C) bf16
    # Full-width q projection (attention scale pre-folded into the weight).
    qf = jnp.dot(x, qw_ref[...],
                 preferred_element_type=jnp.float32).astype(jnp.bfloat16)

    head_outs = []
    for h in range(nh):                                              # static unroll
        qh = qf[:, h * d:(h + 1) * d]                                # (TQ, d)
        # Scores against pre-transposed per-head K (d, Nkv).
        s = jnp.dot(qh, kt_ref[0, h],
                    preferred_element_type=jnp.float32)              # (TQ, Nkv)
        s = s - jnp.max(s, axis=-1, keepdims=True)
        p = jnp.exp(s)
        p = p * pl.reciprocal(jnp.sum(p, axis=-1, keepdims=True), approx=True)
        oh = jnp.dot(p.astype(jnp.bfloat16), v_ref[0, h],
                     preferred_element_type=jnp.float32)             # (TQ, d)
        head_outs.append(oh.astype(jnp.bfloat16))

    o_cat = head_outs[0] if nh == 1 else jnp.concatenate(head_outs, axis=-1)
    out = jnp.dot(o_cat, pw_ref[...],
                  preferred_element_type=jnp.float32)                # (TQ, C)
    o_ref[0] = (out + pb_ref[...]).astype(o_ref.dtype)               # single write


# ----------------------------------------------------------------------------
# Tiling / VMEM sizing helpers
# ----------------------------------------------------------------------------

def _vmem_budget_bytes():
    cap = 64 * 1024 * 1024
    try:
        info = pltpu.get_tpu_info()
        cap = int(getattr(info, "vmem_capacity_bytes", cap))
    except Exception:
        pass
    # Leave headroom for compiler-internal scratch / spills.
    return max(16 * 1024 * 1024, min((cap * 3) // 4, 100 * 1024 * 1024))


def _q_tile_cap(nkv, c, budget):
    """Largest TQ (rows) such that the attention kernel's working set fits."""
    # Per-batch-resident K^T / V (x2 pipeline buffers each) + resident weights.
    fixed = 2 * (2 * nkv * c * 2) + 2 * (2 * c * c * 2) + (2 << 20)
    # Per query row: bf16 x tile (x2 buf), f32 out tile (x2 buf), q-projection
    # intermediates, ~3 (row, Nkv) f32 score / softmax temporaries.
    per_row = 2 * (c * 2) + 2 * (c * 4) + c * 6 + 3 * nkv * 4
    avail = budget - fixed
    if avail <= per_row * 8:
        return 8
    return int(min(2048, avail // per_row))


def _pick_q_tile(n, cap):
    """Largest tile dividing n, multiple of 16 (bf16 sublanes) if possible."""
    cap = int(cap)
    if n <= cap:
        return n
    fallback = None
    for t in range(min(cap, n), 7, -1):
        if n % t:
            continue
        if t % 16 == 0:
            return t
        if fallback is None and t % 8 == 0:
            fallback = t
    return fallback if fallback is not None else n


# ----------------------------------------------------------------------------
# Wrapper
# ----------------------------------------------------------------------------

def attention_forward(x, H, W, params, *, num_heads, sr_ratio, q_tile=None):
    """SegFormer Attention forward.  x: (B, N, C) float32, N == H*W."""
    B, N, C = x.shape
    assert C % num_heads == 0
    nh = num_heads
    d = C // nh
    scale = d ** (-0.5)
    budget = _vmem_budget_bytes()

    cparams_1d = pltpu.CompilerParams(dimension_semantics=("parallel",),
                                      vmem_limit_bytes=budget)

    # ---- parameter prep (trace-time, tiny tensors) --------------------------
    x_bf = x.astype(jnp.bfloat16)
    qw = (params['q_w'] * scale).astype(jnp.bfloat16)                # (C, C)
    kvw = params['kv_w'].astype(jnp.bfloat16)                        # (C, 2C)
    pw = params['proj_w'].astype(jnp.bfloat16)                       # (C, C)
    pb = params['proj_b'].reshape(1, C).astype(jnp.float32)

    # ---- prologue: kv source + full-width K/V projection, once per batch ----
    if sr_ratio > 1:
        sr = sr_ratio
        assert H % sr == 0 and W % sr == 0, "H, W must be divisible by sr_ratio"
        # Patch extraction (pure layout glue): (B,N,C) -> (B, Nkv, sr*sr*C);
        # patch feature order (kh, kw, c) matches the conv-weight flattening.
        xi = x.reshape(B, H, W, C).reshape(B, H // sr, sr, W // sr, sr, C)
        xp = xi.transpose(0, 1, 3, 2, 4, 5).reshape(
            B, (H // sr) * (W // sr), sr * sr * C).astype(jnp.bfloat16)
        Nkv, P = xp.shape[1], xp.shape[2]

        srw = params['sr_wmat'].astype(jnp.bfloat16)                 # (P, C)
        srb = params['sr_b'].reshape(1, C).astype(jnp.float32)
        nw = params['norm_w'].reshape(1, C).astype(jnp.float32)
        nb = params['norm_b'].reshape(1, C).astype(jnp.float32)

        kv = pl.pallas_call(
            _kv_prep_sr_kernel,
            out_shape=jax.ShapeDtypeStruct((B, Nkv, 2 * C), jnp.bfloat16),
            grid=(B,),
            in_specs=[
                pl.BlockSpec((1, Nkv, P), lambda b: (b, 0, 0)),      # patches
                pl.BlockSpec((P, C), lambda b: (0, 0)),              # sr conv weight
                pl.BlockSpec((1, C), lambda b: (0, 0)),              # sr conv bias
                pl.BlockSpec((1, C), lambda b: (0, 0)),              # LN weight
                pl.BlockSpec((1, C), lambda b: (0, 0)),              # LN bias
                pl.BlockSpec((C, 2 * C), lambda b: (0, 0)),          # kv weight
            ],
            out_specs=pl.BlockSpec((1, Nkv, 2 * C), lambda b: (b, 0, 0)),
            compiler_params=cparams_1d,
        )(xp, srw, srb, nw, nb, kvw)
    else:
        Nkv = N
        kv = pl.pallas_call(
            _kv_prep_kernel,
            out_shape=jax.ShapeDtypeStruct((B, Nkv, 2 * C), jnp.bfloat16),
            grid=(B,),
            in_specs=[
                pl.BlockSpec((1, N, C), lambda b: (b, 0, 0)),
                pl.BlockSpec((C, 2 * C), lambda b: (0, 0)),
            ],
            out_specs=pl.BlockSpec((1, Nkv, 2 * C), lambda b: (b, 0, 0)),
            compiler_params=cparams_1d,
        )(x_bf, kvw)

    # Head-major layouts, K pre-transposed (wrapper-side layout plumbing only).
    k = kv[..., :C].reshape(B, Nkv, nh, d)
    v = kv[..., C:].reshape(B, Nkv, nh, d)
    kt = k.transpose(0, 2, 3, 1)                                     # (B, nh, d, Nkv)
    vh = v.transpose(0, 2, 1, 3)                                     # (B, nh, Nkv, d)

    # ---- attention: grid (B, N//TQ), heads unrolled in-kernel ---------------
    # TODO(synk): flash-style KV-axis chunking for sr==1 with very large N;
    # currently handled by shrinking TQ so the (TQ, Nkv) score fits the budget.
    cap = q_tile if q_tile is not None else _q_tile_cap(Nkv, C, budget)
    tq = _pick_q_tile(N, cap)
    nq = N // tq

    # TODO(synk): lane-dense (multiple-of-128) output repacking for C<128
    # stages skipped — the required in-kernel (tq,C)->(tq*C/128,128) reshape is
    # a relayout whose lowering was not verified on all shapes.
    out = pl.pallas_call(
        functools.partial(_attn_kernel, nh=nh, d=d),
        out_shape=jax.ShapeDtypeStruct((B, N, C), jnp.float32),
        grid=(B, nq),
        in_specs=[
            pl.BlockSpec((1, tq, C), lambda b, i: (b, i, 0)),          # x q-tile
            pl.BlockSpec((1, nh, d, Nkv), lambda b, i: (b, 0, 0, 0)),  # K^T / batch
            pl.BlockSpec((1, nh, Nkv, d), lambda b, i: (b, 0, 0, 0)),  # V   / batch
            pl.BlockSpec((C, C), lambda b, i: (0, 0)),                 # q weight
            pl.BlockSpec((C, C), lambda b, i: (0, 0)),                 # proj weight
            pl.BlockSpec((1, C), lambda b, i: (0, 0)),                 # proj bias
        ],
        out_specs=pl.BlockSpec((1, tq, C), lambda b, i: (b, i, 0)),
        compiler_params=pltpu.CompilerParams(
            dimension_semantics=("parallel", "parallel"),
            vmem_limit_bytes=budget),
    )(x_bf, kt, vh, qw, pw, pb)
    return out


# ----------------------------------------------------------------------------
# Pure-JAX reference (mirrors the PyTorch module, dropout p=0) + test
# ----------------------------------------------------------------------------

def _reference_forward(x, H, W, params, *, num_heads, sr_ratio):
    B, N, C = x.shape
    d = C // num_heads
    scale = d ** (-0.5)
    q = x @ params['q_w']
    if sr_ratio > 1:
        sr = sr_ratio
        xi = x.reshape(B, H, W, C).reshape(B, H // sr, sr, W // sr, sr, C)
        xp = xi.transpose(0, 1, 3, 2, 4, 5).reshape(B, -1, sr * sr * C)
        xs = xp @ params['sr_wmat'] + params['sr_b']
        mu = xs.mean(-1, keepdims=True)
        var = ((xs - mu) ** 2).mean(-1, keepdims=True)
        xn = (xs - mu) / jnp.sqrt(var + 1e-5) * params['norm_w'] + params['norm_b']
    else:
        xn = x
    kv = xn @ params['kv_w']
    k, v = kv[..., :C], kv[..., C:]
    qh = q.reshape(B, N, num_heads, d).transpose(0, 2, 1, 3)
    kh = k.reshape(B, -1, num_heads, d).transpose(0, 2, 1, 3)
    vh = v.reshape(B, -1, num_heads, d).transpose(0, 2, 1, 3)
    attn = jnp.einsum('bhnd,bhmd->bhnm', qh, kh) * scale
    attn = jax.nn.softmax(attn, axis=-1)
    o = jnp.einsum('bhnm,bhmd->bhnd', attn, vh)
    o = o.transpose(0, 2, 1, 3).reshape(B, N, C)
    return o @ params['proj_w'] + params['proj_b']


if __name__ == "__main__":
    # Small shapes consistent with the module: dim=64, 2 heads, 8x8 tokens, sr=2.
    B, H, W = 2, 8, 8
    C, num_heads, sr_ratio = 64, 2, 2
    N = H * W

    key = jax.random.PRNGKey(0)
    ks = jax.random.split(key, 6)
    x = jax.random.normal(ks[0], (B, N, C), jnp.float32)

    # Deterministic synthetic parameters mirroring the module's __init__ shapes.
    fan_out = sr_ratio * sr_ratio * C
    conv_w = jax.random.normal(ks[4], (C, C, sr_ratio, sr_ratio),
                               jnp.float32) * math.sqrt(2.0 / fan_out)
    # flatten (out,in,kh,kw) -> (kh*kw*in, out) to match patch ordering (kh,kw,c)
    sr_wmat = jnp.transpose(conv_w, (2, 3, 1, 0)).reshape(sr_ratio * sr_ratio * C, C)
    params = {
        'q_w':    jax.random.normal(ks[1], (C, C), jnp.float32) * 0.02,
        'kv_w':   jax.random.normal(ks[2], (C, 2 * C), jnp.float32) * 0.02,
        'proj_w': jax.random.normal(ks[3], (C, C), jnp.float32) * 0.02,
        'proj_b': jnp.zeros((1, C), jnp.float32),
        'sr_wmat': sr_wmat,
        'sr_b':   jnp.zeros((1, C), jnp.float32),
        'norm_w': jnp.ones((1, C), jnp.float32),
        'norm_b': jnp.zeros((1, C), jnp.float32),
    }

    # sr_ratio > 1 path (conv + LayerNorm kv source).
    out = attention_forward(x, H, W, params, num_heads=num_heads,
                            sr_ratio=sr_ratio)
    out = jax.block_until_ready(out)
    ref = _reference_forward(x, H, W, params, num_heads=num_heads,
                             sr_ratio=sr_ratio)
    assert out.shape == (B, N, C)
    # bf16 MXU operands -> loosened tolerance vs the f32 reference.
    assert jnp.allclose(out, ref, atol=1e-2, rtol=5e-2), (
        "mismatch vs reference (sr=2): %g" % float(jnp.max(jnp.abs(out - ref))))

    # sr_ratio == 1 path (no conv / LayerNorm; kv from full x).
    out1 = attention_forward(x, H, W, params, num_heads=num_heads, sr_ratio=1)
    out1 = jax.block_until_ready(out1)
    ref1 = _reference_forward(x, H, W, params, num_heads=num_heads, sr_ratio=1)
    assert jnp.allclose(out1, ref1, atol=1e-2, rtol=5e-2), (
        "mismatch vs reference (sr=1): %g" % float(jnp.max(jnp.abs(out1 - ref1))))

    print("KERNEL_OK")
</pallas_src>

<mosaic_0001>
module attributes {stable_mosaic.version = 11 : i64} {
  func.func @_kv_prep_sr_kernel(%arg0: i32, %arg1: memref<1x16x256xbf16, #tpu.memory_space<vmem>>, %arg2: memref<256x64xbf16, #tpu.memory_space<vmem>>, %arg3: memref<1x64xf32, #tpu.memory_space<vmem>>, %arg4: memref<1x64xf32, #tpu.memory_space<vmem>>, %arg5: memref<1x64xf32, #tpu.memory_space<vmem>>, %arg6: memref<64x128xbf16, #tpu.memory_space<vmem>>, %arg7: memref<1x16x128xbf16, #tpu.memory_space<vmem>>) attributes {dimension_semantics = [#tpu.dimension_semantics<parallel>], iteration_bounds = array<i64: 2>, scalar_prefetch = 0 : i64, scratch_operands = 0 : i64, tpu.core_type = #tpu.core_type<tc>, window_params = [{transform_indices = @transform_0, window_bounds = array<i64: 1, 16, 256>}, {pipeline_mode = #tpu.pipeline_mode<synchronous>, transform_indices = @transform_1, window_bounds = array<i64: 256, 64>}, {pipeline_mode = #tpu.pipeline_mode<synchronous>, transform_indices = @transform_2, window_bounds = array<i64: 1, 64>}, {pipeline_mode = #tpu.pipeline_mode<synchronous>, transform_indices = @transform_3, window_bounds = array<i64: 1, 64>}, {pipeline_mode = #tpu.pipeline_mode<synchronous>, transform_indices = @transform_4, window_bounds = array<i64: 1, 64>}, {pipeline_mode = #tpu.pipeline_mode<synchronous>, transform_indices = @transform_5, window_bounds = array<i64: 64, 128>}, {transform_indices = @transform_6, window_bounds = array<i64: 1, 16, 128>}]} {
    %c0 = arith.constant 0 : index
    %c0_0 = arith.constant 0 : index
    %c0_1 = arith.constant 0 : index
    %0 = vector.load %arg1[%c0, %c0_0, %c0_1] : memref<1x16x256xbf16, #tpu.memory_space<vmem>>, vector<1x16x256xbf16>
    %1 = vector.shape_cast %0 : vector<1x16x256xbf16> to vector<16x256xbf16>
    %c0_2 = arith.constant 0 : index
    %c0_3 = arith.constant 0 : index
    %2 = vector.load %arg2[%c0_2, %c0_3] : memref<256x64xbf16, #tpu.memory_space<vmem>>, vector<256x64xbf16>
    %cst = arith.constant dense<0.000000e+00> : vector<16x64xf32>
    %3 = tpu.matmul %1, %2, %cst {dimension_numbers = #tpu.dot_dimension_numbers<[1], [0], [0], [1], [0, 0, 1, 1], [], []>} : vector<16x256xbf16>, vector<256x64xbf16>, vector<16x64xf32> -> vector<16x64xf32>
    %c0_4 = arith.constant 0 : index
    %c0_5 = arith.constant 0 : index
    %4 = vector.load %arg3[%c0_4, %c0_5] : memref<1x64xf32, #tpu.memory_space<vmem>>, vector<1x64xf32>
    %5 = vector.broadcast %4 : vector<1x64xf32> to vector<16x64xf32>
    %6 = arith.addf %3, %5 : vector<16x64xf32>
    %cst_6 = arith.constant dense<0.000000e+00> : vector<16xf32>
    %7 = vector.multi_reduction <add>, %6, %cst_6 [1] : vector<16x64xf32> to vector<16xf32>
    %8 = vector.shape_cast %7 : vector<16xf32> to vector<16x1xf32>
    %cst_7 = arith.constant 6.400000e+01 : f32
    %9 = vector.broadcast %cst_7 : f32 to vector<16x1xf32>
    %10 = arith.divf %8, %9 : vector<16x1xf32>
    %11 = vector.broadcast %10 : vector<16x1xf32> to vector<16x64xf32>
    %12 = arith.subf %6, %11 : vector<16x64xf32>
    %13 = arith.mulf %12, %12 : vector<16x64xf32>
    %cst_8 = arith.constant dense<0.000000e+00> : vector<16xf32>
    %14 = vector.multi_reduction <add>, %13, %cst_8 [1] : vector<16x64xf32> to vector<16xf32>
    %15 = vector.shape_cast %14 : vector<16xf32> to vector<16x1xf32>
    %cst_9 = arith.constant 6.400000e+01 : f32
    %16 = vector.broadcast %cst_9 : f32 to vector<16x1xf32>
    %17 = arith.divf %15, %16 : vector<16x1xf32>
    %18 = vector.broadcast %10 : vector<16x1xf32> to vector<16x64xf32>
    %19 = arith.subf %6, %18 : vector<16x64xf32>
    %cst_10 = arith.constant 9.99999974E-6 : f32
    %20 = vector.broadcast %cst_10 : f32 to vector<16x1xf32>
    %21 = arith.addf %17, %20 : vector<16x1xf32>
    %22 = math.rsqrt %21 : vector<16x1xf32>
    %23 = vector.broadcast %22 : vector<16x1xf32> to vector<16x64xf32>
    %24 = arith.mulf %19, %23 : vector<16x64xf32>
    %c0_11 = arith.constant 0 : index
    %c0_12 = arith.constant 0 : index
    %25 = vector.load %arg4[%c0_11, %c0_12] : memref<1x64xf32, #tpu.memory_space<vmem>>, vector<1x64xf32>
    %26 = vector.broadcast %25 : vector<1x64xf32> to vector<16x64xf32>
    %27 = arith.mulf %24, %26 : vector<16x64xf32>
    %c0_13 = arith.constant 0 : index
    %c0_14 = arith.constant 0 : index
    %28 = vector.load %arg5[%c0_13, %c0_14] : memref<1x64xf32, #tpu.memory_space<vmem>>, vector<1x64xf32>
    %29 = vector.broadcast %28 : vector<1x64xf32> to vector<16x64xf32>
    %30 = arith.addf %27, %29 : vector<16x64xf32>
    %31 = arith.truncf %30 : vector<16x64xf32> to vector<16x64xbf16>
    %c0_15 = arith.constant 0 : index
    %c0_16 = arith.constant 0 : index
    %32 = vector.load %arg6[%c0_15, %c0_16] : memref<64x128xbf16, #tpu.memory_space<vmem>>, vector<64x128xbf16>
    %cst_17 = arith.constant dense<0.000000e+00> : vector<16x128xf32>
    %33 = tpu.matmul %31, %32, %cst_17 {dimension_numbers = #tpu.dot_dimension_numbers<[1], [0], [0], [1], [0, 0, 1, 1], [], []>} : vector<16x64xbf16>, vector<64x128xbf16>, vector<16x128xf32> -> vector<16x128xf32>
    %34 = arith.truncf %33 : vector<16x128xf32> to vector<16x128xbf16>
    %c0_18 = arith.constant 0 : index
    %c0_19 = arith.constant 0 : index
    %c0_20 = arith.constant 0 : index
    %35 = vector.load %arg7[%c0_18, %c0_19, %c0_20] : memref<1x16x128xbf16, #tpu.memory_space<vmem>>, vector<1x16x128xbf16>
    %36 = vector.shape_cast %35 : vector<1x16x128xbf16> to vector<16x128xbf16>
    %37 = vector.shape_cast %34 : vector<16x128xbf16> to vector<1x16x128xbf16>
    tpu.vector_store %arg7[%c0_18, %c0_19, %c0_20], %37 {strides = array<i32>} : memref<1x16x128xbf16, #tpu.memory_space<vmem>>, vector<1x16x128xbf16>,
    return
  }
  func.func @transform_0(%arg0: i32) -> (i32, i32, i32) {
    %c0_i32 = arith.constant 0 : i32
    %c0_i32_0 = arith.constant 0 : i32
    %c0_i32_1 = arith.constant 0 : i32
    return %arg0, %c0_i32, %c0_i32_0 : i32, i32, i32
  }
  func.func @transform_1(%arg0: i32) -> (i32, i32) {
    %c0_i32 = arith.constant 0 : i32
    %c0_i32_0 = arith.constant 0 : i32
    %c0_i32_1 = arith.constant 0 : i32
    return %c0_i32, %c0_i32_0 : i32, i32
  }
  func.func @transform_2(%arg0: i32) -> (i32, i32) {
    %c0_i32 = arith.constant 0 : i32
    %c0_i32_0 = arith.constant 0 : i32
    %c0_i32_1 = arith.constant 0 : i32
    return %c0_i32, %c0_i32_0 : i32, i32
  }
  func.func @transform_3(%arg0: i32) -> (i32, i32) {
    %c0_i32 = arith.constant 0 : i32
    %c0_i32_0 = arith.constant 0 : i32
    %c0_i32_1 = arith.constant 0 : i32
    return %c0_i32, %c0_i32_0 : i32, i32
  }
  func.func @transform_4(%arg0: i32) -> (i32, i32) {
    %c0_i32 = arith.constant 0 : i32
    %c0_i32_0 = arith.constant 0 : i32
    %c0_i32_1 = arith.constant 0 : i32
    return %c0_i32, %c0_i32_0 : i32, i32
  }
  func.func @transform_5(%arg0: i32) -> (i32, i32) {
    %c0_i32 = arith.constant 0 : i32
    %c0_i32_0 = arith.constant 0 : i32
    %c0_i32_1 = arith.constant 0 : i32
    return %c0_i32, %c0_i32_0 : i32, i32
  }
  func.func @transform_6(%arg0: i32) -> (i32, i32, i32) {
    %c0_i32 = arith.constant 0 : i32
    %c0_i32_0 = arith.constant 0 : i32
    %c0_i32_1 = arith.constant 0 : i32
    return %arg0, %c0_i32, %c0_i32_0 : i32, i32, i32
  }
}

</mosaic_0001>

<bundles_post_ra>
// kernel: tpu_custom_call.1
= control target key start
LH: loop header
LB: loop body
LE: loop exit
PB: predicated region body
PF: predicated region fallthrough
CT: control target
= control target key end

     0   :  { %11 = vsyncpa [#allocation3], 0  ;;  %s1087_s0 = inlined_call_operand.vmem [shape: bf16[2,16,256], index: 0, kind: input, shape index: {}]   ;;  %s1088_s1 = inlined_call_operand.vmem [shape: bf16[256,64], index: 1, kind: input, shape index: {}]   ;;  %s1089_s2 = inlined_call_operand.vmem [shape: f32[1,64], index: 2, kind: input, shape index: {}]   ;;  %s1090_s3 = inlined_call_operand.vmem [shape: f32[1,64], index: 3, kind: input, shape index: {}]   ;;  %s1091_s4 = inlined_call_operand.vmem [shape: f32[1,64], index: 4, kind: input, shape index: {}]   ;;  %s1092_s5 = inlined_call_operand.vmem [shape: bf16[64,128], index: 5, kind: input, shape index: {}]   ;;  %s1093_s6 = inlined_call_operand.hbm [shape: bf16[2,16,128], index: 6, kind: output, shape index: {}]  }
   0x1   :  { %13 = vsyncpa [#allocation3 + $0x1], 0  ;;  %s910_s21 = smov 0   ;;  %s912_s22 = smov 0  }
   0x2   :  { %s914_s23 = smov 0   ;;  %s916_s24 = smov 0  }
   0x3 LB: > { %s931_s25 = sadd.s32 4294967295, %s868_s24   ;;  %s648_s26 = sadd.s32 4294967294, %s868_s24   ;;  %s868_s24 = sphi %s916_s24, %s1099_s24   ;;  %s864_s23 = sphi %s914_s23, %s1098_s23   ;;  %s860_s22 = sphi %s912_s22, %s1097_s22   ;;  %s856_s21 = sphi %s910_s21, %s1096_s21  }
   0x4   : > { %s935_s27 = sadd.s32 1, %s868_s24   ;;  %s157_s28 = sadd.s32 1, %s864_s23 }
   0x5   : > { %s154_s29 = ssub.s32 %s868_s24, %s935_s27  ;;  %p167_p0 = scmp.ne.s32.totalorder %s864_s23, %s860_s22 }
   0x6   : > { %p155_p1 = scmp.eq.s32.totalorder %s154_s29, 0  ;;  %p168_p2 = scmp.eq.s32.totalorder %s931_s25, 1 }
   0x7   : > { %p173_p3 = scmp.ne.s32.totalorder %s860_s22, %s856_s21  ;;  %p174_p4 = scmp.eq.s32.totalorder %s648_s26, 1 }
   0x8   : > { %s946_s30 = scalar_select %p155_p1, %s864_s23, %s157_s28  }
   0x9   : > { %p948_p5 = por %p168_p2, %p167_p0  ;;  %p952_p6 = por %p174_p4, %p173_p3 }
   0xa   : > { %p651_p7 = scmp.ge.s32.totalorder %s868_s24, 1  ;;  %p215_p8 = scmp.lt.s32.totalorder %s868_s24, 3 }
   0xc   : > { %p216_p9 = pnand %p651_p7, %p215_p8 }
   0xd   : > { %v779_v0 = vld [vmem:[%s1088_s1 + $0x40] sm:$0xff] (!%p216_p9)   ;;  %v781_v2 = vld [vmem:[%s1088_s1 + $0x48] sm:$0xff] (!%p216_p9)   ;;  %p245_p10 = scmp.lt.s32.totalorder (!%p216_p9), %s931_s25, 1  ;;  %v783_v4 = vld [vmem:[%s1088_s1 + $0x50] sm:$0xff] (!%p216_p9)   ;;  %vm439_vm0 = vcmask (!%p216_p9), 523264   ;;  %v870_v40 = vmov (!%p216_p9), 0.0  }
   0xe   : > { %219 = sbr.rel (%p216_p9) target bundleno = 813 (0x32d), region = 44  ;;  %v780_v1 = vld [vmem:[%s1088_s1] sm:$0xff] (!%p216_p9)   ;;  %697 = vmatprep.subr.bf16.mxu0 (!%p216_p9), %v779_v0  ;;  %v782_v3 = vld [vmem:[%s1088_s1 + $0x8] sm:$0xff] (!%p216_p9)   ;;  %v784_v5 = vld [vmem:[%s1088_s1 + $0x10] sm:$0xff] (!%p216_p9)   ;;  %724 = vmatprep.subr.bf16.mxu1 (!%p216_p9), %v870_v40  ;;  %vm871_vm1 = vmmov (!%p216_p9), 0   ;;  %s242_s15 = sand.u32 (!%p216_p9), 1, %s860_s22  }
   0xf   : > { %698 = vmatpush3.bf16.msra.mxu0 (!%p216_p9), %v780_v1  ;;  %v785_v6 = vld [vmem:[%s1088_s1 + $0x58] sm:$0xff] (!%p216_p9)   ;;  %v787_v8 = vld [vmem:[%s1088_s1 + $0x60] sm:$0xff] (!%p216_p9)   ;;  %v789_v10 = vld [vmem:[%s1088_s1 + $0x68] sm:$0xff] (!%p216_p9)   ;;  %732 = vmatprep.mubr.msk.bf16.mxu1 (!%p216_p9), %vm871_vm1, %v870_v40  ;;  %s652_s17 = sshll.u32 (!%p216_p9), %s242_s15, 3  ;;  %s691_s19 = sshll.u32 (!%p216_p9), %s931_s25, 7 }
  0x10   : > { %699 = vmatprep.subr.bf16.mxu0 (!%p216_p9), %v781_v2  ;;  %v786_v7 = vld [vmem:[%s1088_s1 + $0x18] sm:$0xff] (!%p216_p9)   ;;  %v788_v9 = vld [vmem:[%s1088_s1 + $0x20] sm:$0xff] (!%p216_p9)   ;;  %v790_v11 = vld [vmem:[%s1088_s1 + $0x28] sm:$0xff] (!%p216_p9)   ;;  %s244_s18 = scalar_lea.vmem (!%p216_p9), [#allocation2], %s652_s17  ;;  %s1044_s28 = scalar_lea.hbm (!%p216_p9), %s1093_s6, %s691_s19 }
  0x11   : > { %v791_v13 = vld [vmem:[%s1088_s1 + $0x70] sm:$0xff] (!%p216_p9)   ;;  %v793_v15 = vld [vmem:[%s1088_s1 + $0x78] sm:$0xff] (!%p216_p9)   ;;  %v655_v20 = vld [vmem:[%s1089_s2] ss:$0 sm:$0xff] (!%p216_p9)  ;;  %s1046_s29 = scalar_lea.sflag (!%p216_p9), [#allocation3], %s242_s15 }
  0x12   : > { %v792_v14 = vld [vmem:[%s1088_s1 + $0x30] sm:$0xff] (!%p216_p9)   ;;  %v794_v16 = vld [vmem:[%s1088_s1 + $0x38] sm:$0xff] (!%p216_p9)   ;;  %v798_v39 = vld [vmem:[%s1092_s5] sm:$0xff] (!%p216_p9)  }
  0x13   : > { %700 = vmatpush3.bf16.msra.mxu0 (!%p216_p9), %v782_v3  ;;  %725 = vmatpush3.bf16.msra.mxu1 (!%p216_p9), %v798_v39  ;;  %v799_v41 = vld [vmem:[%s1092_s5 + $0x8] sm:$0xff] (!%p216_p9)   ;;  %v800_v42 = vld [vmem:[%s1092_s5 + $0x10] sm:$0xff] (!%p216_p9)   ;;  %v801_v43 = vld [vmem:[%s1092_s5 + $0x18] sm:$0xff] (!%p216_p9)  }
  0x14   : > { %701 = vmatprep.subr.bf16.mxu0 (!%p216_p9), %v783_v4  ;;  %726 = vmatprep.subr.bf16.mxu1 (!%p216_p9), %v870_v40  ;;  %v674_v52 = vld [vmem:[%s1090_s3] ss:$0 sm:$0xff] (!%p216_p9) }
  0x15   : > { %s246_s26 = scalar_select %p245_p10, %s931_s25, 1  ;;  %v675_v56 = vld [vmem:[%s1091_s4] ss:$0 sm:$0xff] }
  0x16   : > { %s872_s25 = smov [#allocation2]  }
  0x17   : > { %702 = vmatpush3.bf16.msra.mxu0 %v784_v5  ;;  %s688_s11 = sshll.u32 %s246_s26, 4  ;;  %727 = vmatpush3.bf16.msra.mxu1 %v799_v41  ;;  %s810_s10 = sshll.u32 %s872_s25, 4  ;;  %s811_s10 = int_to_ptr.vmem [resolvable:$false] %s810_s10 }
  0x18   : > { %703 = vmatprep.subr.bf16.mxu0 %v785_v6  ;;  %s249_s16 = scalar_lea.vmem %s1087_s0, %s688_s11  ;;  %728 = vmatprep.subr.bf16.mxu1 %v870_v40  ;;  %s812_s11 = scalar_lea.vmem %s811_s10, 256 }
  0x19   : > { %v797_v12 = vld [vmem:[%s249_s16 + $0x4] ss:$8 sps:$4 sm:$0xff]   ;;  %v795_v17 = vld [vmem:[%s249_s16] ss:$8 sps:$4 sm:$0xff]   ;;  %s586_s16 = sshll.u32 %s244_s18, 4  ;;  %s1039_s16 = int_to_ptr.vmem [resolvable:$true] %s586_s16 }
  0x1a   : > { %430 = vmatprep.mubr.bf16.mxu0 %v797_v12  ;;  %s806_s9 = scalar_lea.vmem %s1039_s16, 128  ;;  %p813_p0 = scmp.lt.s32.totalorder %s1039_s16, %s811_s10 }
  0x1b   : > { %704 = vmatpush3.bf16.msra.mxu0 %v786_v7  ;;  %729 = vmatpush3.bf16.msra.mxu1 %v800_v42  ;;  %p807_p11 = scmp.ne.s32.totalorder %s1039_s16, %s806_s9  ;;  %p814_p1 = scmp.lt.s32.totalorder %s812_s11, %s806_s9 }
  0x1c   : > { %705 = vmatprep.subr.bf16.mxu0 %v787_v8  ;;  %730 = vmatprep.subr.bf16.mxu1 %v870_v40 }
  0x1d   : > { %p808_p12 = pnand %p807_p11, %p948_p5  ;;  %p815_p2 = por %p814_p1, %p813_p0 }
  0x1f   : > { %706 = vmatpush3.bf16.msra.mxu0 %v788_v9  ;;  %731 = vmatpush3.bf16.msra.mxu1 %v801_v43  ;;  %p809_p13 = pneg %p808_p12 }
  0x20   : > { %707 = vmatprep.subr.bf16.mxu0 %v789_v10 }
  0x21   : > { %p816_p3 = pnand %p815_p2, %p809_p13 }
  0x23   : > { %708 = vmatpush3.bf16.msra.mxu0 %v790_v11 }
  0x24   : > { %709 = vmatprep.subr.bf16.mxu0 %v791_v13 }
  0x27   : > { %710 = vmatpush3.bf16.msra.mxu0 %v792_v14 }
  0x28   : > { %711 = vmatprep.subr.bf16.mxu0 %v793_v15 }
  0x2b   : > { %712 = vmatpush3.bf16.msra.mxu0 %v794_v16 }
  0x2e   : > { %431 = vmatmul.mubr.bf16.vlgmr.msra.gmra.mrb[0].mxu0 %v795_v17 }
 0x101   : > { %v713_v18 = vpop.f32.mrb[0].mxu0 }
 0x102   : > { %v714_v19 = vpop.f32.mrb[1].mxu0 }
 0x103   : > { %v715_v21 = vadd.f32 %v714_v19, %v713_v18  ;;  %v716_v22 = vpop.f32.mrb[2].mxu0 }
 0x104   : > { %v717_v23 = vpop.f32.mrb[3].mxu0 }
 0x105   : > { %v718_v24 = vadd.f32 %v717_v23, %v716_v22  ;;  %v433_v25 = vadd.f32 %v715_v21, %v655_v20 }
 0x107   : > { %v440_v26 = vsel %vm439_vm0, %v433_v25, 0.0  ;;  %v436_v27 = vadd.f32 %v718_v24, %v655_v20 }
 0x108   : > { %441 = vadd.xlane.f32.xlu0 %v440_v26 }
 0x109   : > { %v443_v28 = vsel %vm439_vm0, %v436_v27, 0.0 }
 0x10c   : > { %444 = vadd.xlane.f32.xlu0 %v443_v28 }
 0x195   : > { %v442_v29 = vpop.xlane.xlu0 %441 }
 0x196   : > { %v447_v30 = vmul.f32 0.015625, %v442_v29 }
 0x198   : > { %v449_v31 = vsub.f32 %v433_v25, %v447_v30 }
 0x199   : > { %v445_v32 = vpop.xlane.xlu0 %444 }
 0x19a   : > { %v448_v33 = vmul.f32 0.015625, %v445_v32  ;;  %v451_v34 = vmul.f32 %v449_v31, %v449_v31 }
 0x19c   : > { %v450_v35 = vsub.f32 %v436_v27, %v448_v33  ;;  %v453_v36 = vsel %vm439_vm0, %v451_v34, 0.0 }
 0x19d   : > { %454 = vadd.xlane.f32.xlu1 %v453_v36 }
 0x19e   : > { %v452_v37 = vmul.f32 %v450_v35, %v450_v35 }
 0x1a0   : > { %v456_v38 = vsel %vm439_vm0, %v452_v37, 0.0 }
 0x1a1   : > { %457 = vadd.xlane.f32.xlu1 %v456_v38 }
 0x22a   : > { %v455_v44 = vpop.xlane.xlu1 %454 }
 0x22b   : > { %v459_v45 = vmul.f32 0.015625, %v455_v44 }
 0x22d   : > { %v461_v46 = vadd.f32 1e-05, %v459_v45 }
 0x22e   : > { %v458_v47 = vpop.xlane.xlu1 %457 }
 0x22f   : > { %802 = vrsqrt.f32 %v461_v46  ;;  %v460_v48 = vmul.f32 0.015625, %v458_v47 }
 0x231   : > { %v462_v49 = vadd.f32 1e-05, %v460_v48 }
 0x233   : > { %804 = vrsqrt.f32 %v462_v49 }
 0x239   : > { %v803_v50 = vpop.eup %802 }
 0x23a   : > { %v465_v51 = vmul.f32 %v803_v50, %v449_v31 }
 0x23c   : > { %v474_v55 = vmul.f32 %v674_v52, %v465_v51 }
 0x23d   : > { %v805_v53 = vpop.eup %804 }
 0x23e   : > { %v466_v54 = vmul.f32 %v805_v53, %v450_v35  ;;  %v483_v58 = vadd.f32 %v675_v56, %v474_v55 }
 0x240   : > { %v475_v57 = vmul.f32 %v674_v52, %v466_v54 }
 0x242   : > { %v484_v59 = vadd.f32 %v675_v56, %v475_v57 }
 0x244   : > { %v485_v60 = vpack.c.bf16 %v484_v59, %v483_v58 }
 0x246   : > { %733 = vmatmul.mubr.msk.bf16.vlgmr.msra.gmra.mrb[0].mxu1 %vm439_vm0, %v485_v60 }
 0x319   : > { %v555_v61 = vpop.f32.mrb[0].mxu1 }
 0x31a   : > { %v734_v62 = vpop.f32.mrb[1].mxu1 }
 0x31b   : > { %v558_v63 = vpop.f32.mrb[2].mxu1 }
 0x31c   : > { %v695_v0 = vpack.c.bf16 %v558_v63, %v555_v61  ;;  %v735_v1 = vpop.f32.mrb[3].mxu1 }
 0x31e   : > { %696 = vst [vmem:[%s244_s18] sm:$0xff] %v695_v0  }
 0x31f   : > { %819 = shalt.err (!%p816_p3)
}
 0x320   : > { %s820_s12 = scalar_lea.hbm %s1044_s28, 128  ;;  %s824_s15 = scalar_lea.hbm %s1093_s6, 256 }
 0x321   : > { %p821_p4 = scmp.ne.s32.totalorder %s1044_s28, %s820_s12  ;;  %p825_p9 = scmp.lt.u32.totalorder %s1044_s28, %s1093_s6 }
 0x322   : > { %p826_p10 = scmp.lt.u32.totalorder %s824_s15, %s820_s12  ;;  %p828_p12 = scmp.lt.u32.totalorder %s820_s12, %s1044_s28 }
 0x323   : > { %p822_p7 = pnand %p821_p4, %p948_p5 }
 0x324   : > { %p827_p11 = por %p826_p10, %p825_p9 }
 0x325   : > { %p823_p8 = pneg %p822_p7 }
 0x326   : > { %p829_p13 = por %p828_p12, %p827_p11 }
 0x328   : > { %p830_p0 = pnand %p829_p13, %p823_p8 }
 0x32a   : > { %833 = shalt.err (!%p830_p0)
}
 0x32b   : > { %s873_s19 = smov 64   ;;  %s874_s20 = smov 4  }
 0x32c   : > { %736 = dma.vmem_to_hbm [thread:$0]  (%p948_p5), %s1039_s16, 128, %s1044_s28, %s1046_s29, %s873_s19, %s873_s19, %s874_s20  }
 0x32d PF: > { %p742_p1 = scmp.ge.s32.totalorder %s868_s24, 2  ;;  %s601_s26 = sand.u32 1, %s856_s21  }
 0x32e   : > { %s602_s9 = scalar_lea.sflag [#allocation3], %s601_s26 }
 0x32f   : > { %p739_p2 = pnand %p742_p1, %p952_p6 }
 0x331   : > { %851 = dma.done.wait (!%p739_p2), %s602_s9, 128  }
 0x332   : > { %853 = vsyncadd (!%p739_p2), %s602_s9, 4294967168  ;;  %p16_p3 = scmp.ge.s32.totalorder %s935_s27, 4   ;;  %s1096_s21 = smov %s860_s22 }
 0x333   : > { %s1097_s22 = smov %s864_s23  ;;  %s1098_s23 = smov %s946_s30 }
 0x334   : > { %s1099_s24 = smov %s935_s27  ;;  %18 = sbr.rel (!%p16_p3) target bundleno = 3 (0x3), region = 79 }
 0x33b   :  { %607 = vsyncpa [#allocation3], 1 }
 0x33c   :  { %609 = vsyncpa [#allocation3 + $0x1], 1 }

</bundles_post_ra>
